<compile_context>
chip_gen: v7x
topology: tpu7x:2x2x1
jax: 0.10.0
libtpu: 0.0.40
codegen_flags: <defaults>
</compile_context>

<pallas_src>
import jax
import jax.numpy as jnp
from jax import lax
from jax.experimental import pallas as pl
from jax.experimental.pallas import tpu as pltpu

K = 7          # Conv1d kernel size in Doubleconv_37
LANE = 128     # TPU lane width


def _round_up(x, m):
    return (x + m - 1) // m * m


def _doubleconv_kernel(x_ref, w1_ref, b1_ref, w2_ref, b2_ref, o_ref, y_ref):
    # x_ref : (1, 1, TL_in, Cin_p)  bf16  input tile (includes 2*(K-1) halo rows)
    # w1_ref: (K*Cin_p, Cp)         bf16  conv1 weights, taps folded into rows
    # b1_ref: (1, Cp)               f32
    # w2_ref: (K*Cp, Cp)            bf16
    # b2_ref: (1, Cp)               f32
    # o_ref : (1, TL_out, Cp)       f32   output tile (lane-dense, Cp % 128 == 0)
    # y_ref : (TL_out + K - 1, Cp)  bf16  VMEM scratch for the conv1 output
    tl_out = o_ref.shape[1]
    tl1 = tl_out + (K - 1)

    # ---- conv1: im2col over the K taps -> a single MXU matmul (contraction K*Cin_p)
    lhs1 = jnp.concatenate(
        [x_ref[0, 0, pl.ds(k, tl1), :] for k in range(K)], axis=1)        # (tl1, K*Cin_p)
    y = jnp.dot(lhs1, w1_ref[...], preferred_element_type=jnp.float32)    # (tl1, Cp) f32
    y = jnp.maximum(y + b1_ref[...], 0.0)                                 # bias+ReLU in f32
    y_ref[...] = y.astype(jnp.bfloat16)                                   # explicit VMEM intermediate

    # ---- conv2: same structure, contraction K*Cp
    lhs2 = jnp.concatenate(
        [y_ref[pl.ds(k, tl_out), :] for k in range(K)], axis=1)           # (tl_out, K*Cp)
    z = jnp.dot(lhs2, w2_ref[...], preferred_element_type=jnp.float32)
    z = jnp.maximum(z + b2_ref[...], 0.0)
    o_ref[0] = z.astype(o_ref.dtype)


def doubleconv_37(x_ncl, w1, b1, w2, b2, *, max_l_tile=512):
    """x_ncl: (B, C_in, L) f32, PyTorch NCL layout.
    w1: (C_out, C_in, K), b1: (C_out,), w2: (C_out, C_out, K), b2: (C_out,)
    Returns (B, C_out, L - 2*(K-1)), matching nn.Conv1d (VALID) -> ReLU x2."""
    B, C_in, L = x_ncl.shape
    C_out = w1.shape[0]
    L_out = L - 2 * (K - 1)
    assert L_out > 0

    # lane-pad channels (for genuinely tiny C one could instead keep a (C, L)
    # layout with L on lanes + pltpu.roll taps; padding keeps the MXU path uniform)
    Cin_p = _round_up(C_in, LANE)
    Cout_p = _round_up(C_out, LANE)

    # L tiling: sublane-aligned output tile, capped so double-buffered input tile
    # + bf16 intermediate + f32 output tile stay far under the scoped VMEM limit
    # on every generation (v5e/v6e/v7x).
    tl_out = min(max_l_tile, _round_up(L_out, 8))
    nt = pl.cdiv(L_out, tl_out)
    l_out_pad = nt * tl_out
    tl_in = tl_out + 2 * (K - 1)
    l_in_pad = l_out_pad + 2 * (K - 1)

    # channels-last, bf16, zero-padded length / channels
    x_nlc = jnp.transpose(x_ncl, (0, 2, 1)).astype(jnp.bfloat16)          # (B, L, C_in)
    x_nlc = jnp.pad(x_nlc, ((0, 0), (0, l_in_pad - L), (0, Cin_p - C_in)))
    # pre-haloed L tiles: tile t covers rows [t*tl_out, t*tl_out + tl_in)
    x_win = jnp.stack(
        [x_nlc[:, t * tl_out: t * tl_out + tl_in, :] for t in range(nt)], axis=1)

    # weights: (C_out, C_in, K) -> (K, C_in_p, C_out_p) -> (K*C_in_p, C_out_p)
    w1_k = jnp.pad(jnp.transpose(w1, (2, 1, 0)),
                   ((0, 0), (0, Cin_p - C_in), (0, Cout_p - C_out)))
    w1_mat = w1_k.reshape(K * Cin_p, Cout_p).astype(jnp.bfloat16)
    w2_k = jnp.pad(jnp.transpose(w2, (2, 1, 0)),
                   ((0, 0), (0, Cout_p - C_out), (0, Cout_p - C_out)))
    w2_mat = w2_k.reshape(K * Cout_p, Cout_p).astype(jnp.bfloat16)
    b1_p = jnp.pad(b1, (0, Cout_p - C_out)).reshape(1, Cout_p).astype(jnp.float32)
    b2_p = jnp.pad(b2, (0, Cout_p - C_out)).reshape(1, Cout_p).astype(jnp.float32)

    out_pad = pl.pallas_call(
        _doubleconv_kernel,
        out_shape=jax.ShapeDtypeStruct((B, l_out_pad, Cout_p), jnp.float32),
        grid_spec=pltpu.PrefetchScalarGridSpec(
            num_scalar_prefetch=0,
            grid=(B, nt),
            in_specs=[
                pl.BlockSpec((1, 1, tl_in, Cin_p), lambda b, t: (b, t, 0, 0)),
                pl.BlockSpec((K * Cin_p, Cout_p), lambda b, t: (0, 0)),
                pl.BlockSpec((1, Cout_p), lambda b, t: (0, 0)),
                pl.BlockSpec((K * Cout_p, Cout_p), lambda b, t: (0, 0)),
                pl.BlockSpec((1, Cout_p), lambda b, t: (0, 0)),
            ],
            out_specs=pl.BlockSpec((1, tl_out, Cout_p), lambda b, t: (b, t, 0)),
            scratch_shapes=[pltpu.VMEM((tl_out + K - 1, Cout_p), jnp.bfloat16)],
        ),
        compiler_params=pltpu.CompilerParams(
            dimension_semantics=("parallel", "parallel"),
            vmem_limit_bytes=32 * 1024 * 1024,
        ),
    )(x_win, w1_mat, b1_p, w2_mat, b2_p)

    # drop channel/length padding, back to NCL
    return jnp.transpose(out_pad[:, :L_out, :C_out], (0, 2, 1)).astype(x_ncl.dtype)


def _reference(x_ncl, w1, b1, w2, b2):
    # Pure-JAX reference mirroring the kernel's bf16 matmul operands / f32 accumulation.
    bf = lambda a: a.astype(jnp.bfloat16).astype(jnp.float32)
    dn = ("NCH", "OIH", "NCH")
    y = lax.conv_general_dilated(bf(x_ncl), bf(w1), (1,), "VALID",
                                 dimension_numbers=dn,
                                 precision=lax.Precision.HIGHEST) + b1[None, :, None]
    y = jnp.maximum(y, 0.0)
    z = lax.conv_general_dilated(bf(y), bf(w2), (1,), "VALID",
                                 dimension_numbers=dn,
                                 precision=lax.Precision.HIGHEST) + b2[None, :, None]
    return jnp.maximum(z, 0.0)


if __name__ == "__main__":
    B, C_in, C_out, L = 2, 4, 8, 32   # small, consistent with Conv1d(ch_in, ch_out, 7)

    key = jax.random.PRNGKey(0)
    kx, k1, k2, k3, k4 = jax.random.split(key, 5)

    x = jax.random.normal(kx, (B, C_in, L), dtype=jnp.float32)
    bound1 = 1.0 / (C_in * K) ** 0.5
    bound2 = 1.0 / (C_out * K) ** 0.5
    w1 = jax.random.uniform(k1, (C_out, C_in, K), jnp.float32, -bound1, bound1)
    b1 = jax.random.uniform(k2, (C_out,), jnp.float32, -bound1, bound1)
    w2 = jax.random.uniform(k3, (C_out, C_out, K), jnp.float32, -bound2, bound2)
    b2 = jax.random.uniform(k4, (C_out,), jnp.float32, -bound2, bound2)

    out = doubleconv_37(x, w1, b1, w2, b2)
    jax.block_until_ready(out)

    ref = _reference(x, w1, b1, w2, b2)
    assert out.shape == (B, C_out, L - 2 * (K - 1)), out.shape
    max_err = float(jnp.max(jnp.abs(out - ref)))
    # bf16 MXU operands / f32 accumulation: only accumulation-order noise vs reference.
    assert max_err < 1e-2, max_err

    print("KERNEL_OK")
</pallas_src>

<mosaic_0001>
module attributes {stable_mosaic.version = 11 : i64} {
  func.func @_doubleconv_kernel(%arg0: i32, %arg1: i32, %arg2: memref<1x1x36x128xbf16, #tpu.memory_space<vmem>>, %arg3: memref<896x128xbf16, #tpu.memory_space<vmem>>, %arg4: memref<1x128xf32, #tpu.memory_space<vmem>>, %arg5: memref<896x128xbf16, #tpu.memory_space<vmem>>, %arg6: memref<1x128xf32, #tpu.memory_space<vmem>>, %arg7: memref<1x24x128xf32, #tpu.memory_space<vmem>>, %arg8: memref<30x128xbf16, #tpu.memory_space<vmem>>) attributes {dimension_semantics = [#tpu.dimension_semantics<parallel>, #tpu.dimension_semantics<parallel>], iteration_bounds = array<i64: 2, 1>, scalar_prefetch = 0 : i64, scratch_operands = 1 : i64, tpu.core_type = #tpu.core_type<tc>, window_params = [{transform_indices = @transform_0, window_bounds = array<i64: 1, 1, 36, 128>}, {pipeline_mode = #tpu.pipeline_mode<synchronous>, transform_indices = @transform_1, window_bounds = array<i64: 896, 128>}, {pipeline_mode = #tpu.pipeline_mode<synchronous>, transform_indices = @transform_2, window_bounds = array<i64: 1, 128>}, {pipeline_mode = #tpu.pipeline_mode<synchronous>, transform_indices = @transform_3, window_bounds = array<i64: 896, 128>}, {pipeline_mode = #tpu.pipeline_mode<synchronous>, transform_indices = @transform_4, window_bounds = array<i64: 1, 128>}, {transform_indices = @transform_5, window_bounds = array<i64: 1, 24, 128>}]} {
    %c0 = arith.constant 0 : index
    %c0_0 = arith.constant 0 : index
    %c0_1 = arith.constant 0 : index
    %c0_2 = arith.constant 0 : index
    %0 = vector.load %arg2[%c0, %c0_0, %c0_1, %c0_2] : memref<1x1x36x128xbf16, #tpu.memory_space<vmem>>, vector<1x1x30x128xbf16>
    %1 = vector.shape_cast %0 : vector<1x1x30x128xbf16> to vector<30x128xbf16>
    %c0_3 = arith.constant 0 : index
    %c0_4 = arith.constant 0 : index
    %c1 = arith.constant 1 : index
    %c0_5 = arith.constant 0 : index
    %2 = vector.load %arg2[%c0_3, %c0_4, %c1, %c0_5] : memref<1x1x36x128xbf16, #tpu.memory_space<vmem>>, vector<1x1x30x128xbf16>
    %3 = vector.shape_cast %2 : vector<1x1x30x128xbf16> to vector<30x128xbf16>
    %c0_6 = arith.constant 0 : index
    %c0_7 = arith.constant 0 : index
    %c2 = arith.constant 2 : index
    %c0_8 = arith.constant 0 : index
    %4 = vector.load %arg2[%c0_6, %c0_7, %c2, %c0_8] : memref<1x1x36x128xbf16, #tpu.memory_space<vmem>>, vector<1x1x30x128xbf16>
    %5 = vector.shape_cast %4 : vector<1x1x30x128xbf16> to vector<30x128xbf16>
    %c0_9 = arith.constant 0 : index
    %c0_10 = arith.constant 0 : index
    %c3 = arith.constant 3 : index
    %c0_11 = arith.constant 0 : index
    %6 = vector.load %arg2[%c0_9, %c0_10, %c3, %c0_11] : memref<1x1x36x128xbf16, #tpu.memory_space<vmem>>, vector<1x1x30x128xbf16>
    %7 = vector.shape_cast %6 : vector<1x1x30x128xbf16> to vector<30x128xbf16>
    %c0_12 = arith.constant 0 : index
    %c0_13 = arith.constant 0 : index
    %c4 = arith.constant 4 : index
    %c0_14 = arith.constant 0 : index
    %8 = vector.load %arg2[%c0_12, %c0_13, %c4, %c0_14] : memref<1x1x36x128xbf16, #tpu.memory_space<vmem>>, vector<1x1x30x128xbf16>
    %9 = vector.shape_cast %8 : vector<1x1x30x128xbf16> to vector<30x128xbf16>
    %c0_15 = arith.constant 0 : index
    %c0_16 = arith.constant 0 : index
    %c5 = arith.constant 5 : index
    %c0_17 = arith.constant 0 : index
    %10 = vector.load %arg2[%c0_15, %c0_16, %c5, %c0_17] : memref<1x1x36x128xbf16, #tpu.memory_space<vmem>>, vector<1x1x30x128xbf16>
    %11 = vector.shape_cast %10 : vector<1x1x30x128xbf16> to vector<30x128xbf16>
    %c0_18 = arith.constant 0 : index
    %c0_19 = arith.constant 0 : index
    %c6 = arith.constant 6 : index
    %c0_20 = arith.constant 0 : index
    %12 = vector.load %arg2[%c0_18, %c0_19, %c6, %c0_20] : memref<1x1x36x128xbf16, #tpu.memory_space<vmem>>, vector<1x1x30x128xbf16>
    %13 = vector.shape_cast %12 : vector<1x1x30x128xbf16> to vector<30x128xbf16>
    %14 = tpu.concatenate %1, %3, %5, %7, %9, %11, %13 in 1 : vector<30x128xbf16>, vector<30x128xbf16>, vector<30x128xbf16>, vector<30x128xbf16>, vector<30x128xbf16>, vector<30x128xbf16>, vector<30x128xbf16> -> vector<30x896xbf16>
    %c0_21 = arith.constant 0 : index
    %c0_22 = arith.constant 0 : index
    %15 = vector.load %arg3[%c0_21, %c0_22] : memref<896x128xbf16, #tpu.memory_space<vmem>>, vector<896x128xbf16>
    %cst = arith.constant dense<0.000000e+00> : vector<30x128xf32>
    %16 = tpu.matmul %14, %15, %cst {dimension_numbers = #tpu.dot_dimension_numbers<[1], [0], [0], [1], [0, 0, 1, 1], [], []>} : vector<30x896xbf16>, vector<896x128xbf16>, vector<30x128xf32> -> vector<30x128xf32>
    %c0_23 = arith.constant 0 : index
    %c0_24 = arith.constant 0 : index
    %17 = vector.load %arg4[%c0_23, %c0_24] : memref<1x128xf32, #tpu.memory_space<vmem>>, vector<1x128xf32>
    %18 = vector.broadcast %17 : vector<1x128xf32> to vector<30x128xf32>
    %19 = arith.addf %16, %18 : vector<30x128xf32>
    %cst_25 = arith.constant 0.000000e+00 : f32
    %20 = vector.broadcast %cst_25 : f32 to vector<30x128xf32>
    %21 = arith.maximumf %19, %20 : vector<30x128xf32>
    %22 = arith.truncf %21 : vector<30x128xf32> to vector<30x128xbf16>
    %c0_26 = arith.constant 0 : index
    %c0_27 = arith.constant 0 : index
    %23 = vector.load %arg8[%c0_26, %c0_27] : memref<30x128xbf16, #tpu.memory_space<vmem>>, vector<30x128xbf16>
    tpu.vector_store %arg8[%c0_26, %c0_27], %22 {strides = array<i32>} : memref<30x128xbf16, #tpu.memory_space<vmem>>, vector<30x128xbf16>,
    %c0_28 = arith.constant 0 : index
    %c0_29 = arith.constant 0 : index
    %24 = vector.load %arg8[%c0_28, %c0_29] : memref<30x128xbf16, #tpu.memory_space<vmem>>, vector<24x128xbf16>
    %c1_30 = arith.constant 1 : index
    %c0_31 = arith.constant 0 : index
    %25 = vector.load %arg8[%c1_30, %c0_31] : memref<30x128xbf16, #tpu.memory_space<vmem>>, vector<24x128xbf16>
    %c2_32 = arith.constant 2 : index
    %c0_33 = arith.constant 0 : index
    %26 = vector.load %arg8[%c2_32, %c0_33] : memref<30x128xbf16, #tpu.memory_space<vmem>>, vector<24x128xbf16>
    %c3_34 = arith.constant 3 : index
    %c0_35 = arith.constant 0 : index
    %27 = vector.load %arg8[%c3_34, %c0_35] : memref<30x128xbf16, #tpu.memory_space<vmem>>, vector<24x128xbf16>
    %c4_36 = arith.constant 4 : index
    %c0_37 = arith.constant 0 : index
    %28 = vector.load %arg8[%c4_36, %c0_37] : memref<30x128xbf16, #tpu.memory_space<vmem>>, vector<24x128xbf16>
    %c5_38 = arith.constant 5 : index
    %c0_39 = arith.constant 0 : index
    %29 = vector.load %arg8[%c5_38, %c0_39] : memref<30x128xbf16, #tpu.memory_space<vmem>>, vector<24x128xbf16>
    %c6_40 = arith.constant 6 : index
    %c0_41 = arith.constant 0 : index
    %30 = vector.load %arg8[%c6_40, %c0_41] : memref<30x128xbf16, #tpu.memory_space<vmem>>, vector<24x128xbf16>
    %31 = tpu.concatenate %24, %25, %26, %27, %28, %29, %30 in 1 : vector<24x128xbf16>, vector<24x128xbf16>, vector<24x128xbf16>, vector<24x128xbf16>, vector<24x128xbf16>, vector<24x128xbf16>, vector<24x128xbf16> -> vector<24x896xbf16>
    %c0_42 = arith.constant 0 : index
    %c0_43 = arith.constant 0 : index
    %32 = vector.load %arg5[%c0_42, %c0_43] : memref<896x128xbf16, #tpu.memory_space<vmem>>, vector<896x128xbf16>
    %cst_44 = arith.constant dense<0.000000e+00> : vector<24x128xf32>
    %33 = tpu.matmul %31, %32, %cst_44 {dimension_numbers = #tpu.dot_dimension_numbers<[1], [0], [0], [1], [0, 0, 1, 1], [], []>} : vector<24x896xbf16>, vector<896x128xbf16>, vector<24x128xf32> -> vector<24x128xf32>
    %c0_45 = arith.constant 0 : index
    %c0_46 = arith.constant 0 : index
    %34 = vector.load %arg6[%c0_45, %c0_46] : memref<1x128xf32, #tpu.memory_space<vmem>>, vector<1x128xf32>
    %35 = vector.broadcast %34 : vector<1x128xf32> to vector<24x128xf32>
    %36 = arith.addf %33, %35 : vector<24x128xf32>
    %cst_47 = arith.constant 0.000000e+00 : f32
    %37 = vector.broadcast %cst_47 : f32 to vector<24x128xf32>
    %38 = arith.maximumf %36, %37 : vector<24x128xf32>
    %c0_48 = arith.constant 0 : index
    %c0_49 = arith.constant 0 : index
    %c0_50 = arith.constant 0 : index
    %39 = vector.load %arg7[%c0_48, %c0_49, %c0_50] : memref<1x24x128xf32, #tpu.memory_space<vmem>>, vector<1x24x128xf32>
    %40 = vector.shape_cast %39 : vector<1x24x128xf32> to vector<24x128xf32>
    %41 = vector.shape_cast %38 : vector<24x128xf32> to vector<1x24x128xf32>
    tpu.vector_store %arg7[%c0_48, %c0_49, %c0_50], %41 {strides = array<i32>} : memref<1x24x128xf32, #tpu.memory_space<vmem>>, vector<1x24x128xf32>,
    return
  }
  func.func @transform_0(%arg0: i32, %arg1: i32) -> (i32, i32, i32, i32) {
    %c0_i32 = arith.constant 0 : i32
    %c0_i32_0 = arith.constant 0 : i32
    %c0_i32_1 = arith.constant 0 : i32
    return %arg0, %arg1, %c0_i32, %c0_i32_0 : i32, i32, i32, i32
  }
  func.func @transform_1(%arg0: i32, %arg1: i32) -> (i32, i32) {
    %c0_i32 = arith.constant 0 : i32
    %c0_i32_0 = arith.constant 0 : i32
    %c0_i32_1 = arith.constant 0 : i32
    return %c0_i32, %c0_i32_0 : i32, i32
  }
  func.func @transform_2(%arg0: i32, %arg1: i32) -> (i32, i32) {
    %c0_i32 = arith.constant 0 : i32
    %c0_i32_0 = arith.constant 0 : i32
    %c0_i32_1 = arith.constant 0 : i32
    return %c0_i32, %c0_i32_0 : i32, i32
  }
  func.func @transform_3(%arg0: i32, %arg1: i32) -> (i32, i32) {
    %c0_i32 = arith.constant 0 : i32
    %c0_i32_0 = arith.constant 0 : i32
    %c0_i32_1 = arith.constant 0 : i32
    return %c0_i32, %c0_i32_0 : i32, i32
  }
  func.func @transform_4(%arg0: i32, %arg1: i32) -> (i32, i32) {
    %c0_i32 = arith.constant 0 : i32
    %c0_i32_0 = arith.constant 0 : i32
    %c0_i32_1 = arith.constant 0 : i32
    return %c0_i32, %c0_i32_0 : i32, i32
  }
  func.func @transform_5(%arg0: i32, %arg1: i32) -> (i32, i32, i32) {
    %c0_i32 = arith.constant 0 : i32
    %c0_i32_0 = arith.constant 0 : i32
    return %arg0, %arg1, %c0_i32 : i32, i32, i32
  }
}

</mosaic_0001>

<bundles_post_ra>
// kernel: tpu_custom_call.1
= control target key start
LH: loop header
LB: loop body
LE: loop exit
PB: predicated region body
PF: predicated region fallthrough
CT: control target
= control target key end

     0   :  { %10 = vsyncpa [#allocation4], 0  ;;  %s3038_s0 = inlined_call_operand.vmem [shape: bf16[2,1,36,128], index: 0, kind: input, shape index: {}]   ;;  %s3039_s1 = inlined_call_operand.hbm [shape: bf16[896,128], index: 1, kind: input, shape index: {}]   ;;  %s3040_s2 = inlined_call_operand.vmem [shape: f32[1,128], index: 2, kind: input, shape index: {}]   ;;  %s3041_s3 = inlined_call_operand.hbm [shape: bf16[896,128], index: 3, kind: input, shape index: {}]   ;;  %s3042_s4 = inlined_call_operand.vmem [shape: f32[1,128], index: 4, kind: input, shape index: {}]   ;;  %s3043_s5 = inlined_call_operand.hbm [shape: f32[2,24,128], index: 5, kind: output, shape index: {}]  }
   0x1   :  { %11 = vsyncpa [#allocation7], 0 }
   0x2   :  { %12 = vsyncpa [#allocation5], 0 }
   0x3   :  { %14 = vsyncpa [#allocation5 + $0x1], 0  ;;  %s2738_s18 = smov 0   ;;  %s2740_s19 = smov 0  }
   0x4   :  { %s2742_s20 = smov 0   ;;  %s2744_s21 = smov 0  }
   0x5   :  { %s2746_s22 = smov 0   ;;  %s2748_s23 = smov 0  }
   0x6 LB: > { %s1962_s24 = sadd.s32 4294967295, %s2699_s23   ;;  %s1963_s25 = sadd.s32 4294967294, %s2699_s23   ;;  %s2699_s23 = sphi %s2748_s23, %s20_s23   ;;  %s2695_s22 = sphi %s2746_s22, %s3064_s22   ;;  %s2691_s21 = sphi %s2744_s21, %s3063_s21   ;;  %s2687_s20 = sphi %s2742_s20, %s3062_s20   ;;  %s2683_s19 = sphi %s2740_s19, %s3061_s19   ;;  %s2679_s18 = sphi %s2738_s18, %s3060_s18  }
   0x7   : > { %s32_s26 = sadd.s32 1, %s2695_s22  ;;  %s153_s27 = sadd.s32 1, %s2687_s20 }
   0x8   : > { %p34_p0 = scmp.ge.s32.totalorder %s32_s26, 2  ;;  %p163_p1 = scmp.ne.s32.totalorder %s2687_s20, %s2683_s19 }
   0x9   : > { %p164_p2 = scmp.eq.s32.totalorder %s1962_s24, 1  ;;  %p169_p3 = scmp.ne.s32.totalorder %s2683_s19, %s2679_s18 }
   0xa   : > { %s3066_s26 = smov (%p34_p0, %s32_s26), 0  ;;  %p170_p5 = scmp.eq.s32.totalorder %s1963_s25, 1 }
   0xb   : > { %3049 = sst [smem:[#allocation12_spill]] %s3066_s26  ;;  %p2778_p4 = por %p164_p2, %p163_p1 }
   0xc   : > { %s148_s29 = ssub.s32 %s2695_s22, %s3066_s26  ;;  %p1964_p6 = scmp.ge.s32.totalorder %s2699_s23, 1 }
   0xd   : > { %s3050_s28 = scalar_select %p2778_p4, 1, 0 }
   0xe   : > { %p151_p7 = scmp.eq.s32.totalorder %s148_s29, 0  ;;  %p2785_p8 = por %p170_p5, %p169_p3 }
   0xf   : > { %p177_p9 = scmp.lt.s32.totalorder %s2699_s23, 3  ;;  %p2797_p11 = scmp.eq.s32.totalorder %s1962_s24, 0 }
  0x10   : > { %s3051_s30 = scalar_select %p2785_p8, 1, 0 }
  0x11   : > { %s2791_s6 = scalar_select %p151_p7, %s2687_s20, %s153_s27  }
  0x12   : > { %p2793_p10 = pnand %p1964_p6, %p177_p9  ;;  %s2701_s9 = smov [#allocation3]  }
  0x13   : > { %s3053_s8 = scalar_select %p2797_p11, 1, 0 }
  0x14   : > { %s3052_s7 = scalar_select %p2793_p10, 1, 0 }
  0x15   : > { %p2359_p12 = pneg %p2793_p10  ;;  %s189_s10 = sshll.u32 %s2701_s9, 4  ;;  %s190_s10 = int_to_ptr.vmem [resolvable:$true] %s189_s10 }
  0x16   : > { %s2702_s12 = smov [#allocation6]   ;;  %s2557_s16 = scalar_lea.hbm %s3039_s1, 7168 }
  0x17   : > { %p2805_p13 = pnand %p2797_p11, %p2359_p12  ;;  %s205_s13 = sshll.u32 %s2702_s12, 4  ;;  %s2809_s13 = int_to_ptr.vmem [resolvable:$true] %s205_s13 }
  0x18   : > { %p2558_p0 = scmp.ne.s32.totalorder %s3039_s1, %s2557_s16  ;;  %p2564_p5 = scmp.lt.u32.totalorder %s2557_s16, %s3039_s1 }
  0x19   : > { %p2559_p1 = pneg %p2805_p13 }
  0x1b   : > { %p2560_p2 = pnand %p2559_p1, %p2558_p0 }
  0x1d   : > { %p2561_p3 = pneg %p2560_p2 }
  0x1f   : > { %p2566_p6 = pnand %p2564_p5, %p2561_p3 }
  0x21   : > { %2569 = shalt.err (!%p2566_p6)
}
  0x22   : > { %s2570_s29 = scalar_lea.vmem %s190_s10, 7168  ;;  %p2578_p8 = scmp.lt.s32.totalorder %s190_s10, %s190_s10 }
  0x23   : > { %p2571_p7 = scmp.ne.s32.totalorder %s190_s10, %s2570_s29  ;;  %p2579_p4 = scmp.lt.s32.totalorder %s2570_s29, %s2570_s29 }
  0x25   : > { %p2573_p9 = pnand %p2571_p7, %p2559_p1  ;;  %p2580_p11 = por %p2579_p4, %p2578_p8 }
  0x27   : > { %p2574_p12 = pneg %p2573_p9 }
  0x29   : > { %p2581_p10 = pnand %p2580_p11, %p2574_p12 }
  0x2b   : > { %2584 = shalt.err (!%p2581_p10)
}
  0x2c   : > { %s2703_s9 = smov 64   ;;  %s2704_s12 = smov 4  }
  0x2d   : > { %2362 = dma.hbm_to_vmem [thread:$0]  (!%p2805_p13), %s3039_s1, 7168, %s190_s10, [#allocation4], %s2703_s9, %s2703_s9, %s2704_s12  }
  0x2e   : > { %s2585_s24 = scalar_lea.hbm %s3041_s3, 7168 }
  0x2f   : > { %p2586_p0 = scmp.ne.s32.totalorder %s3041_s3, %s2585_s24  ;;  %p2592_p10 = scmp.lt.u32.totalorder %s2585_s24, %s3041_s3 }
  0x31   : > { %p2588_p4 = pnand %p2586_p0, %p2559_p1 }
  0x33   : > { %p2589_p8 = pneg %p2588_p4 }
  0x35   : > { %p2594_p11 = pnand %p2592_p10, %p2589_p8 }
  0x37   : > { %2597 = shalt.err (!%p2594_p11)
}
  0x38   : > { %s2598_s10 = scalar_lea.vmem %s2809_s13, 7168  ;;  %p2606_p6 = scmp.lt.s32.totalorder %s2809_s13, %s2809_s13 }
  0x39   : > { %p2599_p2 = scmp.ne.s32.totalorder %s2809_s13, %s2598_s10  ;;  %p2607_p7 = scmp.lt.s32.totalorder %s2598_s10, %s2598_s10 }
  0x3b   : > { %p2601_p3 = pnand %p2599_p2, %p2559_p1  ;;  %p2608_p9 = por %p2607_p7, %p2606_p6 }
  0x3d   : > { %p2602_p5 = pneg %p2601_p3 }
  0x3f   : > { %p2609_p12 = pnand %p2608_p9, %p2602_p5 }
  0x41   : > { %2612 = shalt.err (!%p2609_p12)
}
  0x42   : > { %2365 = dma.hbm_to_vmem [thread:$0]  (!%p2805_p13), %s3041_s3, 7168, %s2809_s13, [#allocation7], %s2703_s9, %s2703_s9, %s2704_s12  }
  0x43   : > { %p3055_p0 = scmp.ne.s32.totalorder %s3052_s7, 0 }
  0x44   : > { %p3056_p4 = scmp.ne.s32.totalorder (!%p3055_p0), %s3053_s8, 0 }
  0x45   : > { %236 = sbr.rel (%p3055_p0) target bundleno = 669 (0x29d), region = 40 }
  0x4c   : > { %2666 = dma.done.wait (%p3056_p4), [#allocation4], 7168  }
  0x4d   : > { %2668 = vsyncadd (%p3056_p4), [#allocation4], 4294960128 }
  0x4e   : > { %2670 = dma.done.wait (%p3056_p4), [#allocation7], 7168  }
  0x4f   : > { %2672 = vsyncadd (%p3056_p4), [#allocation7], 4294960128  ;;  %v2429_v0 = vld [vmem:[#allocation3 + $0x40] sm:$0xff]   ;;  %v2433_v4 = vld [vmem:[#allocation3 + $0x48] sm:$0xff]   ;;  %p272_p13 = scmp.lt.s32.totalorder %s2691_s21, 1  ;;  %vm329_vm2 = vcmask 1046528  }
  0x50   : > { %v2430_v1 = vld [vmem:[#allocation3] sm:$0xff]   ;;  %2118 = vmatprep.subr.bf16.mxu0 %v2429_v0  ;;  %v2434_v5 = vld [vmem:[#allocation3 + $0x8] sm:$0xff]   ;;  %v2437_v8 = vld [vmem:[#allocation3 + $0x50] sm:$0xff]   ;;  %vm308_vm0 = vsmask.f32 7424  ;;  %vm399_vm3 = vcmask 1044480  }
  0x51   : > { %v2431_v2 = vld [vmem:[#allocation3 + $0xc0] sm:$0xff]   ;;  %2119 = vmatpush3.bf16.msra.mxu0 %v2430_v1  ;;  %v2435_v6 = vld [vmem:[#allocation3 + $0xc8] sm:$0xff]   ;;  %v2438_v9 = vld [vmem:[#allocation3 + $0x10] sm:$0xff]   ;;  %s273_s7 = scalar_select %p272_p13, %s2691_s21, 1  ;;  %vm338_vm1 = vsmask.f32 6400 }
  0x52   : > { %v2432_v3 = vld [vmem:[#allocation3 + $0x80] sm:$0xff]   ;;  %2146 = vmatprep.subr.bf16.mxu1 %v2431_v2  ;;  %2120 = vmatprep.subr.bf16.mxu0 %v2433_v4  ;;  %v2436_v7 = vld [vmem:[#allocation3 + $0x88] sm:$0xff]   ;;  %v2439_v10 = vld [vmem:[#allocation3 + $0xd0] sm:$0xff]   ;;  %vm372_vm4 = vsmask.f32 5376  ;;  %vm361_vm5 = vcmask 1045504  }
  0x53   : > { %2147 = vmatpush3.bf16.msra.mxu1 %v2432_v3  ;;  %v2440_v11 = vld [vmem:[#allocation3 + $0x90] sm:$0xff]   ;;  %v2441_v12 = vld [vmem:[#allocation3 + $0x58] sm:$0xff]   ;;  %v2445_v16 = vld [vmem:[#allocation3 + $0x60] sm:$0xff]   ;;  %s2347_s8 = smul.u32 20, %s273_s7  ;;  %s269_s24 = sand.u32 1, %s2683_s19  }
  0x54   : > { %2148 = vmatprep.subr.bf16.mxu1 %v2435_v6  ;;  %v2442_v13 = vld [vmem:[#allocation3 + $0x18] sm:$0xff]   ;;  %v2446_v17 = vld [vmem:[#allocation3 + $0x20] sm:$0xff]   ;;  %v2449_v20 = vld [vmem:[#allocation3 + $0x68] sm:$0xff]   ;;  %s2346_s25 = smul.u32 24, %s269_s24  ;;  %p3057_p8 = scmp.ne.s32.totalorder %s3050_s28, 0 }
  0x55   : > { %2121 = vmatpush3.bf16.msra.mxu0 %v2434_v5  ;;  %v2443_v14 = vld [vmem:[#allocation3 + $0xd8] sm:$0xff]   ;;  %v2447_v18 = vld [vmem:[#allocation3 + $0xe0] sm:$0xff]   ;;  %v2450_v21 = vld [vmem:[#allocation3 + $0x28] sm:$0xff]   ;;  %s2873_s9 = scalar_lea.vmem %s3038_s0, %s2347_s8  ;;  %s2348_s10 = smul.u32 384, %s2691_s21 }
  0x56   : > { %2122 = vmatprep.subr.bf16.mxu0 %v2437_v8  ;;  %v2444_v15 = vld [vmem:[#allocation3 + $0x98] sm:$0xff]   ;;  %v2448_v19 = vld [vmem:[#allocation3 + $0xa0] sm:$0xff]   ;;  %v2451_v22 = vld [vmem:[#allocation3 + $0xe8] sm:$0xff]   ;;  %s271_s27 = scalar_lea.vmem [#allocation8], %s2346_s25  ;;  %s2992_s8 = scalar_lea.sflag [#allocation5], %s269_s24 }
  0x57   : > { %2149 = vmatpush3.bf16.msra.mxu1 %v2436_v7  ;;  %v2452_v23 = vld [vmem:[#allocation3 + $0xa8] sm:$0xff]   ;;  %v2453_v24 = vld [vmem:[#allocation3 + $0x70] sm:$0xff]   ;;  %v2457_v28 = vld [vmem:[#allocation3 + $0x78] sm:$0xff]   ;;  %s1858_s29 = sshll.u32 %s271_s27, 4  ;;  %s2988_s7 = scalar_lea.hbm %s3043_s5, %s2348_s10  ;;  %s2983_s29 = int_to_ptr.vmem [resolvable:$true] %s1858_s29 }
  0x58   : > { %2150 = vmatprep.subr.bf16.mxu1 %v2439_v10  ;;  %v2454_v25 = vld [vmem:[#allocation3 + $0x30] sm:$0xff]   ;;  %v2458_v29 = vld [vmem:[#allocation3 + $0x38] sm:$0xff]   ;;  %v2463_v40 = vld [vmem:[#allocation3 + $0x140] sm:$0xff]   ;;  %s2613_s11 = scalar_lea.vmem %s2983_s29, 384  ;;  %s2705_s21 = smov [#allocation8]  }
  0x59   : > { %2123 = vmatpush3.bf16.msra.mxu0 %v2438_v9  ;;  %v2455_v26 = vld [vmem:[#allocation3 + $0xf0] sm:$0xff]   ;;  %v2459_v30 = vld [vmem:[#allocation3 + $0xf8] sm:$0xff]   ;;  %v2465_v51 = vld [vmem:[#allocation3 + $0x100] sm:$0xff]   ;;  %p2614_p1 = scmp.ne.s32.totalorder %s2983_s29, %s2613_s11  ;;  %s2617_s13 = sshll.u32 %s2705_s21, 4  ;;  %s2618_s13 = int_to_ptr.vmem [resolvable:$false] %s2617_s13 }
  0x5a   : > { %2124 = vmatprep.subr.bf16.mxu0 %v2441_v12  ;;  %v2456_v27 = vld [vmem:[#allocation3 + $0xb0] sm:$0xff]   ;;  %v2880_v33 = vld [vmem:[%s2873_s9 + $0x8] sm:$0xf]  ;;  %v287_v34 = vld [vmem:[%s2873_s9 + $0xc] sm:$0xf]  ;;  %p2620_p2 = scmp.lt.s32.totalorder %s2983_s29, %s2618_s13 }
  0x5b   : > { %2151 = vmatpush3.bf16.msra.mxu1 %v2440_v11  ;;  %v283_v31 = vld [vmem:[%s2873_s9] sm:$0xf]  ;;  %v2877_v32 = vld [vmem:[%s2873_s9 + $0x4] sm:$0xf]  ;;  %v2885_v36 = vcombine.low %v2880_v33, %v287_v34  ;;  %v2462_v37 = vld [vmem:[#allocation3 + $0xb8] sm:$0xff]   ;;  %p2615_p10 = pnand %p2614_p1, %p3057_p8 }
  0x5c   : > { %2152 = vmatprep.subr.bf16.mxu1 %v2443_v14  ;;  %v1972_v35 = vcombine.low %v283_v31, %v2877_v32  ;;  %v288_v41 = vld [vmem:[%s2873_s9] sm:$0xe]  ;;  %v2467_v52 = vld [vmem:[#allocation3 + $0x180] sm:$0xff]   ;;  %v2466_v61 = vld [vmem:[#allocation3 + $0x148] sm:$0xff]  }
  0x5d   : > { %2125 = vmatpush3.bf16.msra.mxu0 %v2442_v13  ;;  %v2889_v42 = vshll.u32 %v2885_v36, 16  ;;  %v2892_v43 = vshrl.u32 %v2885_v36, 16  ;;  %v1975_v44 = vcombine.low %v288_v41, %v2877_v32  ;;  %v331_v46 = vrot.slane %v2885_v36, 1  ;;  %v2468_v0 = vld [vmem:[#allocation3 + $0x108] sm:$0xff]   ;;  %v2469_v3 = vld [vmem:[#allocation3 + $0x150] sm:$0xff]   ;;  %v2472_v6 = vld [vmem:[#allocation3 + $0x158] sm:$0xff]   ;;  %p2616_p11 = pneg %p2615_p10 }
  0x5e   : > { %2126 = vmatprep.subr.bf16.mxu0 %v2445_v16  ;;  %v310_v38 = vshrl.u32 %v1972_v35, 16  ;;  %v312_v39 = vshll.u32 %v1972_v35, 16  ;;  %v2470_v2 = vld [vmem:[#allocation3 + $0x188] sm:$0xff]   ;;  %v2471_v4 = vld [vmem:[#allocation3 + $0x110] sm:$0xff]   ;;  %v2474_v7 = vld [vmem:[#allocation3 + $0x118] sm:$0xff]  }
  0x5f   : > { %2153 = vmatpush3.bf16.msra.mxu1 %v2444_v15  ;;  %v319_v47 = vrot.slane %v2889_v42, 1  ;;  %v340_v48 = vshrl.u32 %v1975_v44, 16  ;;  %v343_v49 = vshll.u32 %v1975_v44, 16  ;;  %v347_v50 = vrot.slane %v2892_v43, 1  ;;  %v2473_v5 = vld [vmem:[#allocation3 + $0x190] sm:$0xff]   ;;  %v2476_v8 = vld [vmem:[#allocation3 + $0x198] sm:$0xff]  }
  0x60   : > { %2154 = vmatprep.subr.bf16.mxu1 %v2447_v18  ;;  %v314_v45 = vrot.slane %v312_v39, 1  ;;  %v348_v54 = vrot.slane %v2889_v42, 2  ;;  %v330_v55 = vrot.slane %v1975_v44, 1  ;;  %v286_v9 = vld [vmem:[%s2873_s9 + $0xc] sm:$0x7]  ;;  %v2475_v10 = vld [vmem:[#allocation3 + $0x160] sm:$0xff]  }
  0x61   : > { %2127 = vmatpush3.bf16.msra.mxu0 %v2446_v17  ;;  %v342_v56 = vrot.slane %v340_v48, 1  ;;  %v345_v57 = vrot.slane %v343_v49, 2  ;;  %v323_v58 = vor.u32 %v2892_v43, %v319_v47  ;;  %v1973_v11 = vcombine.low %v2880_v33, %v286_v9  ;;  %v2477_v12 = vld [vmem:[#allocation3 + $0x120] sm:$0xff]   ;;  %v2478_v16 = vld [vmem:[#allocation3 + $0x168] sm:$0xff]   ;;  %v2486_v34 = vld [vmem:[#allocation3 + $0x178] sm:$0xff]  }
  0x62   : > { %2128 = vmatprep.subr.bf16.mxu0 %v2449_v20  ;;  %v315_v53 = vor.u32 %v314_v45, %v310_v38  ;;  %v349_v60 = vor.u32 %v348_v54, %v347_v50  ;;  %v332_v63 = vsel %vm329_vm2, %v330_v55, %v331_v46  ;;  %v2908_v13 = vld [vmem:[%s2873_s9 + $0x10] ss:$0 sps:$4 sm:$0x11]   ;;  %v381_v18 = vrot.slane %v2892_v43, 2 }
  0x63   : > { %2155 = vmatpush3.bf16.msra.mxu1 %v2448_v19  ;;  %v346_v62 = vor.u32 %v345_v57, %v342_v56  ;;  %v2479_v14 = vld [vmem:[#allocation3 + $0x1a0] sm:$0xff]   ;;  %v352_v15 = vshll.u32 %v2908_v13, 16  ;;  %v2481_v19 = vld [vmem:[#allocation3 + $0x128] sm:$0xff]   ;;  %v382_v20 = vrot.slane %v2889_v42, 3  ;;  %v365_v33 = vrot.slane %v2908_v13, 2 }
  0x64   : > { %2156 = vmatprep.subr.bf16.mxu1 %v2451_v22  ;;  %v320_v59 = vsel %vm308_vm0, %v315_v53, %v319_v47  ;;  %v2484_v22 = vld [vmem:[#allocation3 + $0x1a8] sm:$0xff]   ;;  %v2492_v31 = vld [vmem:[%s2873_s9 + $0x10] ss:$0 sps:$4 sm:$0x33]  }
  0x65   : > { %2129 = vmatpush3.bf16.msra.mxu0 %v2450_v21  ;;  %894 = vmatprep.mubr.bf16.mxu0 %v320_v59  ;;  %v350_v1 = vsel %vm338_vm1, %v346_v62, %v349_v60  ;;  %v354_v17 = vrot.slane %v352_v15, 2  ;;  %v403_v41 = vrot.slane %v2492_v31, 3  ;;  %v386_v42 = vshrl.u32 %v2492_v31, 16  ;;  %v2493_v57 = vld [vmem:[#allocation6 + $0x40] sm:$0xff]   ;;  %v2498_v62 = vld [vmem:[#allocation6 + $0x8] sm:$0xff]  }
  0x66   : > { %2130 = vmatprep.subr.bf16.mxu0 %v2453_v24  ;;  %943 = vmatprep.mubr.bf16.mxu1 %v350_v1  ;;  %v363_v24 = vrot.slane %v2885_v36, 2  ;;  %v389_v43 = vshll.u32 %v2492_v31, 16  ;;  %v383_v45 = vor.u32 %v382_v20, %v381_v18  ;;  %v2495_v59 = vld [vmem:[#allocation6 + $0xc0] sm:$0xff]   ;;  %v2501_v1 = vld [vmem:[#allocation6 + $0x50] sm:$0xff]   ;;  %v2513_v13 = vld [vmem:[#allocation6 + $0x68] sm:$0xff]  }
  0x67   : > { %2157 = vmatpush3.bf16.msra.mxu1 %v2452_v23  ;;  %v355_v21 = vsel %vm338_vm1, %v349_v60, %v354_v17  ;;  %v290_v23 = vld [vmem:[%s2873_s9] sm:$0xc]  ;;  %v388_v48 = vrot.slane %v386_v42, 2  ;;  %v2496_v60 = vld [vmem:[#allocation6 + $0x80] sm:$0xff]   ;;  %v2515_v15 = vld [vmem:[#allocation6 + $0xe8] sm:$0xff]  }
  0x68   : > { %2158 = vmatprep.subr.bf16.mxu1 %v2455_v26  ;;  %v1977_v26 = vcombine.low %v290_v23, %v2877_v32  ;;  %v391_v49 = vrot.slane %v389_v43, 3  ;;  %v366_v56 = vsel %vm361_vm5, %v363_v24, %v365_v33  ;;  %v2509_v9 = vld [vmem:[#allocation6 + $0x60] sm:$0xff]   ;;  %v2516_v17 = vld [vmem:[#allocation6 + $0xa8] sm:$0xff]   ;;  %v2519_v18 = vld [vmem:[#allocation6 + $0xf0] sm:$0xff]  }
  0x69   : > { %2131 = vmatpush3.bf16.msra.mxu0 %v2454_v25  ;;  %v2483_v25 = vld [vmem:[#allocation3 + $0x170] sm:$0xff]   ;;  %v2521_v20 = vld [vmem:[#allocation6 + $0x78] sm:$0xff]  }
  0x6a   : > { %2132 = vmatprep.subr.bf16.mxu0 %v2457_v28  ;;  %v401_v28 = vrot.slane %v2885_v36, 3  ;;  %v377_v38 = vshll.u32 %v1977_v26, 16  ;;  %v362_v39 = vrot.slane %v1977_v26, 2  ;;  %v2522_v23 = vld [vmem:[#allocation6 + $0x38] sm:$0xff]  }
  0x6b   : > { %2159 = vmatpush3.bf16.msra.mxu1 %v2456_v27  ;;  %v292_v27 = vld [vmem:[%s2873_s9] sm:$0x8]  ;;  %s2619_s9 = scalar_lea.vmem %s2618_s13, 768 }
  0x6c   : > { %2160 = vmatprep.subr.bf16.mxu1 %v2459_v30  ;;  %v1979_v30 = vcombine.low %v292_v27, %v2877_v32  ;;  %v379_v44 = vrot.slane %v377_v38, 3  ;;  %v2488_v32 = vld [vmem:[#allocation3 + $0x138] sm:$0xff]   ;;  %v364_v53 = vsel %vm361_vm5, %v362_v39, %v363_v24  ;;  %v404_v55 = vsel %vm399_vm3, %v401_v28, %v403_v41  ;;  %p2621_p3 = scmp.lt.s32.totalorder %s2619_s9, %s2613_s11 }
  0x6d   : > { %2133 = vmatpush3.bf16.msra.mxu0 %v2458_v29  ;;  %v2485_v29 = vld [vmem:[#allocation3 + $0x130] sm:$0xff]   ;;  %v2524_v24 = vld [vmem:[#allocation6 + $0xb8] sm:$0xff]  }
  0x6e   : > { %2174 = vmatprep.subr.bf16.mxu0 %v2463_v40  ;;  %v400_v40 = vrot.slane %v1979_v30, 3  ;;  %p2622_p5 = por %p2621_p3, %p2620_p2 }
  0x6f   : > { %2161 = vmatpush3.bf16.msra.mxu1 %v2462_v37  ;;  %v374_v37 = vshrl.u32 %v1977_v26, 16  ;;  %v2930_v26 = vld [vmem:[#allocation6 + $0x180] sm:$0xff]  }
  0x70   : > { %2306 = vmatprep.subr.bf16.mxu1 %v2467_v52  ;;  %895 = vmatmul.mubr.bf16.vlgmr.msra.gmra.mrb[0].mxu0 %v1972_v35  ;;  %v2487_v35 = vld [vmem:[#allocation3 + $0x1b0] sm:$0xff]   ;;  %v402_v47 = vsel %vm399_vm3, %v400_v40, %v401_v28  ;;  %p2623_p6 = pnand %p2622_p5, %p2616_p11 }
  0x71   : > { %2175 = vmatpush3.bf16.msra.mxu0 %v2465_v51  ;;  %902 = vmatprep.mubr.bf16.mxu0 %v323_v58  ;;  %v376_v36 = vrot.slane %v374_v37, 2  ;;  %v2494_v58 = vld [vmem:[#allocation6] sm:$0xff]   ;;  %v1980_v28 = vld [vmem:[%s3040_s2] ss:$0 sm:$0xff] }
  0x72   : > { %2176 = vmatprep.subr.bf16.mxu0 %v2466_v61  ;;  %944 = vmatmul.mubr.bf16.vlgmr.msra.gmra.mrb[0].mxu1 %v332_v63  ;;  %v2497_v61 = vld [vmem:[#allocation6 + $0x48] sm:$0xff]  }
  0x73   : > { %2307 = vmatpush3.bf16.msra.mxu1 %v2467_v52  ;;  %951 = vmatprep.mubr.bf16.mxu1 %v355_v21  ;;  %v380_v50 = vor.u32 %v379_v44, %v376_v36  ;;  %v392_v52 = vor.u32 %v391_v49, %v388_v48  ;;  %v2499_v63 = vld [vmem:[#allocation6 + $0xc8] sm:$0xff]   ;;  %v2520_v21 = vld [vmem:[#allocation6 + $0xb0] sm:$0xff]  }
  0x74   : > { %2308 = vmatprep.subr.bf16.mxu1 %v2470_v2 }
  0x75   : > { %2177 = vmatpush3.bf16.msra.mxu0 %v2468_v0  ;;  %v384_v51 = vsel %vm372_vm4, %v380_v50, %v383_v45  ;;  %v393_v54 = vsel %vm372_vm4, %v383_v45, %v392_v52  ;;  %v2500_v0 = vld [vmem:[#allocation6 + $0x88] sm:$0xff]  }
  0x76   : > { %2178 = vmatprep.subr.bf16.mxu0 %v2469_v3  ;;  %v2503_v3 = vld [vmem:[#allocation6 + $0xd0] sm:$0xff]  }
  0x77   : > { %2309 = vmatpush3.bf16.msra.mxu1 %v2470_v2  ;;  %v2502_v2 = vld [vmem:[#allocation6 + $0x10] sm:$0xff]  }
  0x78   : > { %2310 = vmatprep.subr.bf16.mxu1 %v2473_v5  ;;  %903 = vmatmul.mubr.bf16.gmra.mrb[4].mxu0 %v1973_v11  ;;  %v2511_v11 = vld [vmem:[#allocation6 + $0xe0] sm:$0xff]  }
  0x79   : > { %2179 = vmatpush3.bf16.msra.mxu0 %v2471_v4  ;;  %992 = vmatprep.mubr.bf16.mxu0 %v384_v51  ;;  %v2504_v4 = vld [vmem:[#allocation6 + $0x90] sm:$0xff]  }
  0x7a   : > { %2180 = vmatprep.subr.bf16.mxu0 %v2472_v6  ;;  %952 = vmatmul.mubr.bf16.gmra.mrb[4].mxu1 %v331_v46  ;;  %v2490_v46 = vld [vmem:[#allocation3 + $0x1b8] sm:$0xff]  }
  0x7b   : > { %2311 = vmatpush3.bf16.msra.mxu1 %v2473_v5  ;;  %2322 = vmatprep.mubr.bf16.mxu1 %v402_v47  ;;  %v2505_v5 = vld [vmem:[#allocation6 + $0x58] sm:$0xff]  }
  0x7c   : > { %2312 = vmatprep.subr.bf16.mxu1 %v2476_v8  ;;  %v2506_v6 = vld [vmem:[#allocation6 + $0x18] sm:$0xff]  }
  0x7d   : > { %2181 = vmatpush3.bf16.msra.mxu0 %v2474_v7  ;;  %v2507_v7 = vld [vmem:[#allocation6 + $0xd8] sm:$0xff]  }
  0x7e   : > { %2182 = vmatprep.subr.bf16.mxu0 %v2475_v10  ;;  %v2510_v10 = vld [vmem:[#allocation6 + $0x20] sm:$0xff]  }
  0x7f   : > { %2313 = vmatpush3.bf16.msra.mxu1 %v2476_v8  ;;  %v2508_v8 = vld [vmem:[#allocation6 + $0x98] sm:$0xff]  }
  0x80   : > { %2314 = vmatprep.subr.bf16.mxu1 %v2479_v14 }
  0x81   : > { %2183 = vmatpush3.bf16.msra.mxu0 %v2477_v12  ;;  %v2512_v12 = vld [vmem:[#allocation6 + $0xa0] sm:$0xff]  }
  0x82   : > { %2184 = vmatprep.subr.bf16.mxu0 %v2478_v16  ;;  %v2517_v16 = vld [vmem:[#allocation6 + $0x70] sm:$0xff]  }
  0x83   : > { %2315 = vmatpush3.bf16.msra.mxu1 %v2479_v14  ;;  %v2514_v14 = vld [vmem:[#allocation6 + $0x28] sm:$0xff]  }
  0x84   : > { %2316 = vmatprep.subr.bf16.mxu1 %v2484_v22 }
  0x85   : > { %2185 = vmatpush3.bf16.msra.mxu0 %v2481_v19  ;;  %v2518_v19 = vld [vmem:[#allocation6 + $0x30] sm:$0xff]  }
  0x86   : > { %2186 = vmatprep.subr.bf16.mxu0 %v2483_v25  ;;  %v2527_v25 = vld [vmem:[#allocation6 + $0x140] sm:$0xff]  }
  0x87   : > { %2317 = vmatpush3.bf16.msra.mxu1 %v2484_v22  ;;  %v2523_v22 = vld [vmem:[#allocation6 + $0xf8] sm:$0xff]  }
  0x88   : > { %2318 = vmatprep.subr.bf16.mxu1 %v2487_v35 }
  0x89   : > { %2187 = vmatpush3.bf16.msra.mxu0 %v2485_v29 }
  0x8a   : > { %2188 = vmatprep.subr.bf16.mxu0 %v2486_v34 }
  0x8b   : > { %2319 = vmatpush3.bf16.msra.mxu1 %v2487_v35 }
  0x8c   : > { %2320 = vmatprep.subr.bf16.mxu1 %v2490_v46 }
  0x8d   : > { %2189 = vmatpush3.bf16.msra.mxu0 %v2488_v32 }
  0x8e   : > { %2212 = vmatprep.subr.bf16.mxu0 %v2493_v57 }
  0x8f   : > { %2321 = vmatpush3.bf16.msra.mxu1 %v2490_v46 }
  0x90   : > { %993 = vmatmul.mubr.bf16.vlgmr.msra.gmra.mrb[8].mxu0 %v364_v53  ;;  %2240 = vmatprep.subr.bf16.mxu1 %v2495_v59 }
  0x91   : > { %1000 = vmatprep.mubr.bf16.mxu0 %v393_v54  ;;  %2213 = vmatpush3.bf16.msra.mxu0 %v2494_v58 }
  0x92   : > { %2323 = vmatmul.mubr.bf16.vlgmr.msra.gmra.mrb[8].mxu1 %v404_v55  ;;  %2214 = vmatprep.subr.bf16.mxu0 %v2497_v61 }
  0x93   : > { %2241 = vmatpush3.bf16.msra.mxu1 %v2496_v60 }
  0x94   : > { %2242 = vmatprep.subr.bf16.mxu1 %v2499_v63 }
  0x95   : > { %2215 = vmatpush3.bf16.msra.mxu0 %v2498_v62 }
  0x96   : > { %2216 = vmatprep.subr.bf16.mxu0 %v2501_v1 }
  0x97   : > { %2243 = vmatpush3.bf16.msra.mxu1 %v2500_v0 }
  0x98   : > { %1001 = vmatmul.mubr.bf16.gmra.mrb[12].mxu0 %v366_v56  ;;  %2244 = vmatprep.subr.bf16.mxu1 %v2503_v3 }
  0x99   : > { %2217 = vmatpush3.bf16.msra.mxu0 %v2502_v2 }
  0x9a   : > { %2218 = vmatprep.subr.bf16.mxu0 %v2505_v5 }
  0x9b   : > { %2245 = vmatpush3.bf16.msra.mxu1 %v2504_v4 }
  0x9c   : > { %2246 = vmatprep.subr.bf16.mxu1 %v2507_v7 }
  0x9d   : > { %2219 = vmatpush3.bf16.msra.mxu0 %v2506_v6 }
  0x9e   : > { %2220 = vmatprep.subr.bf16.mxu0 %v2509_v9 }
  0x9f   : > { %2247 = vmatpush3.bf16.msra.mxu1 %v2508_v8 }
  0xa0   : > { %2248 = vmatprep.subr.bf16.mxu1 %v2511_v11 }
  0xa1   : > { %2221 = vmatpush3.bf16.msra.mxu0 %v2510_v10 }
  0xa2   : > { %2222 = vmatprep.subr.bf16.mxu0 %v2513_v13 }
  0xa3   : > { %2249 = vmatpush3.bf16.msra.mxu1 %v2512_v12 }
  0xa4   : > { %2250 = vmatprep.subr.bf16.mxu1 %v2515_v15 }
  0xa5   : > { %2223 = vmatpush3.bf16.msra.mxu0 %v2514_v14 }
  0xa6   : > { %2224 = vmatprep.subr.bf16.mxu0 %v2517_v16 }
  0xa7   : > { %2251 = vmatpush3.bf16.msra.mxu1 %v2516_v17 }
  0xa8   : > { %2252 = vmatprep.subr.bf16.mxu1 %v2519_v18 }
  0xa9   : > { %2225 = vmatpush3.bf16.msra.mxu0 %v2518_v19 }
  0xaa   : > { %2226 = vmatprep.subr.bf16.mxu0 %v2521_v20 }
  0xab   : > { %2253 = vmatpush3.bf16.msra.mxu1 %v2520_v21 }
  0xac   : > { %2254 = vmatprep.subr.bf16.mxu1 %v2523_v22 }
  0xad   : > { %2227 = vmatpush3.bf16.msra.mxu0 %v2522_v23 }
  0xae   : > { %2268 = vmatprep.subr.bf16.mxu0 %v2527_v25 }
  0xaf   : > { %2255 = vmatpush3.bf16.msra.mxu1 %v2524_v24 }
  0xb0   : > { %2326 = vmatprep.subr.bf16.mxu1 %v2930_v26 }
 0x143   : > { %v2134_v27 = vpop.f32.mrb[0].mxu0 }
 0x144   : > { %v2135_v29 = vpop.f32.mrb[1].mxu0 }
 0x145   : > { %v2136_v30 = vadd.f32 %v2135_v29, %v2134_v27  ;;  %v2137_v31 = vpop.f32.mrb[2].mxu0  ;;  %v2162_v33 = vpop.f32.mrb[0].mxu1 }
 0x146   : > { %v2138_v34 = vpop.f32.mrb[3].mxu0  ;;  %v2163_v38 = vpop.f32.mrb[1].mxu1 }
 0x147   : > { %v897_v35 = vadd.f32 %v2136_v30, %v1980_v28  ;;  %v2139_v37 = vadd.f32 %v2138_v34, %v2137_v31  ;;  %v2164_v39 = vadd.f32 %v2163_v38, %v2162_v33  ;;  %v2165_v40 = vpop.f32.mrb[2].mxu1 }
 0x148   : > { %v2166_v42 = vpop.f32.mrb[3].mxu1 }
 0x149   : > { %v900_v41 = vadd.f32 %v2139_v37, %v1980_v28  ;;  %v946_v43 = vadd.f32 %v2164_v39, %v897_v35  ;;  %v2167_v36 = vadd.f32 %v2166_v42, %v2165_v40 }
 0x14b   : > { %v949_v44 = vadd.f32 %v2167_v36, %v900_v41  ;;  %v2140_v45 = vpop.f32.mrb[4].mxu0 }
 0x14c   : > { %v2141_v32 = vpop.f32.mrb[5].mxu0 }
 0x14d   : > { %v2142_v46 = vadd.f32 %v2141_v32, %v2140_v45  ;;  %v2143_v47 = vpop.f32.mrb[6].mxu0  ;;  %v2168_v51 = vpop.f32.mrb[4].mxu1 }
 0x14e   : > { %v2144_v48 = vpop.f32.mrb[7].mxu0  ;;  %v2169_v52 = vpop.f32.mrb[5].mxu1 }
 0x14f   : > { %v2145_v49 = vadd.f32 %v2144_v48, %v2143_v47  ;;  %v905_v50 = vadd.f32 %v2142_v46, %v1980_v28  ;;  %v2170_v54 = vadd.f32 %v2169_v52, %v2168_v51  ;;  %v2171_v55 = vpop.f32.mrb[6].mxu1 }
 0x150   : > { %v2172_v56 = vpop.f32.mrb[7].mxu1 }
 0x151   : > { %v908_v53 = vadd.f32 %v2145_v49, %v1980_v28  ;;  %v954_v57 = vadd.f32 %v2170_v54, %v905_v50  ;;  %v2173_v58 = vadd.f32 %v2172_v56, %v2171_v55 }
 0x153   : > { %v957_v59 = vadd.f32 %v2173_v58, %v908_v53 }
 0x163   : > { %v2190_v60 = vpop.f32.mrb[8].mxu0 }
 0x164   : > { %v2191_v61 = vpop.f32.mrb[9].mxu0 }
 0x165   : > { %v2192_v62 = vadd.f32 %v2191_v61, %v2190_v60  ;;  %v2193_v63 = vpop.f32.mrb[10].mxu0  ;;  %v2324_v1 = vpop.f32.mrb[8].mxu1 }
 0x166   : > { %v2194_v0 = vpop.f32.mrb[11].mxu0  ;;  %v1043_v4 = vpop.f32.mrb[9].mxu1 }
 0x167   : > { %v2195_v2 = vadd.f32 %v2194_v0, %v2193_v63  ;;  %v995_v3 = vadd.f32 %v2192_v62, %v946_v43  ;;  %v2325_v5 = vpop.f32.mrb[10].mxu1 }
 0x168   : > { %v1046_v8 = vpop.f32.mrb[11].mxu1 }
 0x169   : > { %v1044_v6 = vadd.f32 %v1043_v4, %v995_v3  ;;  %v998_v7 = vadd.f32 %v2195_v2, %v949_v44  ;;  %v2532_v3 = vld [vmem:[#allocation6 + $0x148] sm:$0xff]  }
 0x16b   : > { %v1047_v9 = vadd.f32 %v1046_v8, %v998_v7  ;;  %v2196_v10 = vpop.f32.mrb[12].mxu0  ;;  %v1058_v12 = vmax.f32 %v1044_v6, 0.0  ;;  %v2533_v8 = vld [vmem:[#allocation6 + $0x108] sm:$0xff]  }
 0x16c   : > { %v2197_v11 = vpop.f32.mrb[13].mxu0 }
 0x16d   : > { %v1059_v13 = vmax.f32 %v1047_v9, 0.0  ;;  %v2198_v14 = vadd.f32 %v2197_v11, %v2196_v10  ;;  %v2199_v15 = vpop.f32.mrb[14].mxu0  ;;  %v2534_v9 = vld [vmem:[#allocation6 + $0x188] sm:$0xff]   ;;  %v2535_v11 = vld [vmem:[#allocation6 + $0x150] sm:$0xff]  }
 0x16e   : > { %v2200_v16 = vpop.f32.mrb[15].mxu0 }
 0x16f   : > { %v2116_v17 = vpack.c.bf16 %v1059_v13, %v1058_v12  ;;  %v1003_v18 = vadd.f32 %v2198_v14, %v954_v57  ;;  %v2201_v19 = vadd.f32 %v2200_v16, %v2199_v15  ;;  %v2537_v16 = vld [vmem:[#allocation6 + $0x110] sm:$0xff]  }
 0x171   : > { %2117 = vst [vmem:[#allocation2] sm:$0xff] %v2116_v17   ;;  %v1052_v20 = vadd.f32 %v2324_v1, %v1003_v18  ;;  %v1006_v21 = vadd.f32 %v2201_v19, %v957_v59  ;;  %v2528_v59 = vld [vmem:[#allocation6 + $0x100] sm:$0xff]  }
 0x173   : > { %v1060_v22 = vmax.f32 %v1052_v20, 0.0  ;;  %v1055_v23 = vadd.f32 %v2325_v5, %v1006_v21  ;;  %v2540_v20 = vld [vmem:[#allocation6 + $0x190] sm:$0xff]   ;;  %v2541_v21 = vld [vmem:[#allocation6 + $0x158] sm:$0xff]  }
 0x175   : > { %v2111_v24 = vpack.c.bf16 %v1060_v22, %v1060_v22  ;;  %v1061_v25 = vmax.f32 %v1055_v23, 0.0 }
 0x177   : > { %1080 = vst [vmem:[#allocation2 + $0x8] sm:$0xf] %v2111_v24  ;;  %v2112_v27 = vpack.c.bf16 %v1061_v25, %v1061_v25  ;;  %v2543_v24 = vld [vmem:[#allocation6 + $0x118] sm:$0xff]  }
 0x178   : > { %v1082_v28 = vld [vmem:[#allocation2] sm:$0xf]  ;;  %v2936_v29 = vld [vmem:[#allocation2 + $0x4] sm:$0xf]  ;;  %v2544_v25 = vld [vmem:[#allocation6 + $0x198] sm:$0xff]  }
 0x179   : > { %v1086_v30 = vld [vmem:[#allocation2] sm:$0xe]  ;;  %1081 = vst [vmem:[#allocation2 + $0xc] sm:$0x7] %v2112_v27  ;;  %v2041_v31 = vcombine.low %v1082_v28, %v2936_v29  ;;  %v2545_v27 = vld [vmem:[#allocation6 + $0x160] sm:$0xff]  }
 0x17a   : > { %v2044_v33 = vcombine.low %v1086_v30, %v2936_v29  ;;  %v1088_v40 = vld [vmem:[#allocation2] sm:$0xc]  ;;  %v2547_v30 = vld [vmem:[#allocation6 + $0x1a0] sm:$0xff]  }
 0x17b   : > { %v1107_v34 = vshll.u32 %v2041_v31, 16  ;;  %v1105_v32 = vshrl.u32 %v2041_v31, 16  ;;  %v2952_v48 = vcombine.low %v1088_v40, %v2936_v29  ;;  %v1090_v14 = vld [vmem:[#allocation2] sm:$0x8]  ;;  %v2555_v40 = vld [vmem:[#allocation6 + $0x138] sm:$0xff]  }
 0x17c   : > { %v1133_v35 = vshrl.u32 %v2044_v33, 16  ;;  %v1136_v37 = vshll.u32 %v2044_v33, 16  ;;  %v1124_v5 = vrot.slane %v2044_v33, 1  ;;  %v2048_v17 = vcombine.low %v1090_v14, %v2936_v29  ;;  %v2546_v29 = vld [vmem:[#allocation6 + $0x120] sm:$0xff]   ;;  %v2549_v33 = vld [vmem:[#allocation6 + $0x128] sm:$0xff]  }
 0x17d   : > { %v1109_v39 = vrot.slane %v1107_v34, 1  ;;  %v1163_v61 = vshrl.u32 %v2952_v48, 16  ;;  %v1166_v62 = vshll.u32 %v2952_v48, 16  ;;  %v2550_v34 = vld [vmem:[#allocation6 + $0x1a8] sm:$0xff]  }
 0x17e   : > { %v2940_v38 = vld [vmem:[#allocation2 + $0x8] sm:$0xf]  ;;  %v1135_v46 = vrot.slane %v1133_v35, 1  ;;  %v1138_v47 = vrot.slane %v1136_v37, 2  ;;  %v1184_v23 = vrot.slane %v2048_v17, 3  ;;  %v2551_v35 = vld [vmem:[#allocation6 + $0x170] sm:$0xff]  }
 0x17f   : > { %v1110_v52 = vor.u32 %v1109_v39, %v1105_v32  ;;  %v1165_v12 = vrot.slane %v1163_v61, 2  ;;  %v1168_v13 = vrot.slane %v1166_v62, 3  ;;  %v2042_v18 = vcombine.low %v2940_v38, %v2940_v38  ;;  %v2552_v37 = vld [vmem:[#allocation6 + $0x130] sm:$0xff]   ;;  %v2554_v39 = vld [vmem:[#allocation6 + $0x178] sm:$0xff]  }
 0x180   : > { %v1085_v41 = vld [vmem:[#allocation2 + $0xc] sm:$0x1]  ;;  %v1139_v60 = vor.u32 %v1138_v47, %v1135_v46  ;;  %v2049_v32 = vld [vmem:[%s3042_s4] ss:$0 sm:$0xff] }
 0x181   : > { %v1087_v42 = vld [vmem:[#allocation2 + $0xc] sm:$0x3]  ;;  %v2943_v36 = vcombine.low %v2940_v38, %v1085_v41  ;;  %v1169_v19 = vor.u32 %v1168_v13, %v1165_v12 }
 0x182   : > { %v1089_v43 = vld [vmem:[#allocation2 + $0xc] sm:$0x7]  ;;  %v2946_v44 = vcombine.low %v2940_v38, %v1087_v42 }
 0x183   : > { %v2949_v45 = vcombine.low %v2940_v38, %v1089_v43  ;;  %v1112_v49 = vshll.u32 %v2943_v36, 16  ;;  %v1116_v53 = vshrl.u32 %v2943_v36, 16  ;;  %v1125_v2 = vrot.slane %v2943_v36, 1  ;;  %v2553_v38 = vld [vmem:[#allocation6 + $0x1b0] sm:$0xff]   ;;  %v2556_v41 = vld [vmem:[#allocation6 + $0x1b8] sm:$0xff]  }
 0x184   : > { %v1141_v50 = vshrl.u32 %v2946_v44, 16  ;;  %v1144_v51 = vshll.u32 %v2946_v44, 16  ;;  %v1155_v42 = vrot.slane %v2946_v44, 2  ;;  %v1154_v43 = vrot.slane %v2952_v48, 2 }
 0x185   : > { %v1171_v54 = vshrl.u32 %v2949_v45, 16  ;;  %v1114_v55 = vrot.slane %v1112_v49, 1  ;;  %v1174_v58 = vshll.u32 %v2949_v45, 16  ;;  %v1126_v10 = vsel %vm329_vm2, %v1124_v5, %v1125_v2 }
 0x186   : > { %v1143_v56 = vrot.slane %v1141_v50, 1  ;;  %v1146_v57 = vrot.slane %v1144_v51, 2  ;;  %v1185_v22 = vrot.slane %v2949_v45, 3  ;;  %v1156_v36 = vsel %vm361_vm5, %v1154_v43, %v1155_v42 }
 0x187   : > { %v1115_v63 = vsel %vm308_vm0, %v1110_v52, %v1114_v55  ;;  %v1118_v0 = vor.u32 %v1116_v53, %v1114_v55  ;;  %v1173_v6 = vrot.slane %v1171_v54, 2  ;;  %v1176_v7 = vrot.slane %v1174_v58, 3 }
 0x188   : > { %v1147_v1 = vor.u32 %v1146_v57, %v1143_v56  ;;  %1676 = vmatprep.mubr.bf16.mxu0 %v1115_v63  ;;  %v1186_v28 = vsel %vm399_vm3, %v1184_v23, %v1185_v22 }
 0x189   : > { %1677 = vmatmul.mubr.bf16.vlgmr.msra.gmra.mrb[16].mxu0 %v2041_v31  ;;  %v1177_v15 = vor.u32 %v1176_v7, %v1173_v6  ;;  %v2548_v31 = vld [vmem:[#allocation6 + $0x168] sm:$0xff]  }
 0x18a   : > { %v1148_v4 = vsel %vm338_vm1, %v1139_v60, %v1147_v1  ;;  %2269 = vmatpush3.bf16.msra.mxu0 %v2528_v59  ;;  %1684 = vmatprep.mubr.bf16.mxu0 %v1118_v0 }
 0x18b   : > { %1724 = vmatprep.mubr.bf16.mxu1 %v1148_v4  ;;  %2270 = vmatprep.subr.bf16.mxu0 %v2532_v3 }
 0x18c   : > { %1725 = vmatmul.mubr.bf16.vlgmr.msra.gmra.mrb[12].mxu1 %v1126_v10 }
 0x18d   : > { %2327 = vmatpush3.bf16.msra.mxu1 %v2930_v26  ;;  %1732 = vmatprep.mubr.bf16.mxu1 %v1147_v1  ;;  %v1178_v26 = vsel %vm372_vm4, %v1169_v19, %v1177_v15 }
 0x18e   : > { %2271 = vmatpush3.bf16.msra.mxu0 %v2533_v8  ;;  %2328 = vmatprep.subr.bf16.mxu1 %v2534_v9 }
 0x18f   : > { %2272 = vmatprep.subr.bf16.mxu0 %v2535_v11 }
 0x191   : > { %2329 = vmatpush3.bf16.msra.mxu1 %v2534_v9  ;;  %1685 = vmatmul.mubr.bf16.gmra.mrb[20].mxu0 %v2042_v18 }
 0x192   : > { %2273 = vmatpush3.bf16.msra.mxu0 %v2537_v16  ;;  %1772 = vmatprep.mubr.bf16.mxu0 %v1178_v26 }
 0x193   : > { %2330 = vmatprep.subr.bf16.mxu1 %v2540_v20  ;;  %2274 = vmatprep.subr.bf16.mxu0 %v2541_v21 }
 0x194   : > { %1733 = vmatmul.mubr.bf16.gmra.mrb[16].mxu1 %v1125_v2 }
 0x195   : > { %2331 = vmatpush3.bf16.msra.mxu1 %v2540_v20  ;;  %2342 = vmatprep.mubr.bf16.mxu1 %v1186_v28 }
 0x196   : > { %2275 = vmatpush3.bf16.msra.mxu0 %v2543_v24  ;;  %2332 = vmatprep.subr.bf16.mxu1 %v2544_v25 }
 0x197   : > { %2276 = vmatprep.subr.bf16.mxu0 %v2545_v27 }
 0x199   : > { %2333 = vmatpush3.bf16.msra.mxu1 %v2544_v25 }
 0x19a   : > { %2277 = vmatpush3.bf16.msra.mxu0 %v2546_v29  ;;  %2334 = vmatprep.subr.bf16.mxu1 %v2547_v30 }
 0x19b   : > { %2278 = vmatprep.subr.bf16.mxu0 %v2548_v31 }
 0x19d   : > { %2335 = vmatpush3.bf16.msra.mxu1 %v2547_v30 }
 0x19e   : > { %2279 = vmatpush3.bf16.msra.mxu0 %v2549_v33  ;;  %2336 = vmatprep.subr.bf16.mxu1 %v2550_v34 }
 0x19f   : > { %2280 = vmatprep.subr.bf16.mxu0 %v2551_v35 }
 0x1a1   : > { %2337 = vmatpush3.bf16.msra.mxu1 %v2550_v34 }
 0x1a2   : > { %2281 = vmatpush3.bf16.msra.mxu0 %v2552_v37  ;;  %2338 = vmatprep.subr.bf16.mxu1 %v2553_v38 }
 0x1a3   : > { %2282 = vmatprep.subr.bf16.mxu0 %v2554_v39 }
 0x1a5   : > { %2339 = vmatpush3.bf16.msra.mxu1 %v2553_v38 }
 0x1a6   : > { %2283 = vmatpush3.bf16.msra.mxu0 %v2555_v40  ;;  %2340 = vmatprep.subr.bf16.mxu1 %v2556_v41 }
 0x1a9   : > { %2341 = vmatpush3.bf16.msra.mxu1 %v2556_v41  ;;  %1773 = vmatmul.mubr.bf16.vlgmr.msra.gmra.mrb[24].mxu0 %v1156_v36 }
 0x1aa   : > { %1780 = vmatprep.mubr.bf16.mxu0 %v1177_v15 }
 0x1ac   : > { %2343 = vmatmul.mubr.bf16.vlgmr.msra.gmra.mrb[20].mxu1 %v1185_v22 }
 0x1b1   : > { %1781 = vmatmul.mubr.bf16.gmra.mrb[28].mxu0 %v1155_v42 }
 0x25c   : > { %v2228_v45 = vpop.f32.mrb[16].mxu0 }
 0x25d   : > { %v2229_v46 = vpop.f32.mrb[17].mxu0 }
 0x25e   : > { %v2230_v47 = vadd.f32 %v2229_v46, %v2228_v45  ;;  %v2231_v44 = vpop.f32.mrb[18].mxu0 }
 0x25f   : > { %v2256_v49 = vpop.f32.mrb[12].mxu1  ;;  %v2232_v50 = vpop.f32.mrb[19].mxu0 }
 0x260   : > { %v1679_v51 = vadd.f32 %v2230_v47, %v2049_v32  ;;  %v2233_v52 = vadd.f32 %v2232_v50, %v2231_v44  ;;  %v2257_v48 = vpop.f32.mrb[13].mxu1 }
 0x261   : > { %v2258_v53 = vadd.f32 %v2257_v48, %v2256_v49  ;;  %v2259_v54 = vpop.f32.mrb[14].mxu1 }
 0x262   : > { %v1682_v55 = vadd.f32 %v2233_v52, %v2049_v32  ;;  %v2260_v56 = vpop.f32.mrb[15].mxu1 }
 0x263   : > { %v1727_v57 = vadd.f32 %v2258_v53, %v1679_v51  ;;  %v2261_v58 = vadd.f32 %v2260_v56, %v2259_v54 }
 0x264   : > { %v2234_v59 = vpop.f32.mrb[20].mxu0 }
 0x265   : > { %v1730_v60 = vadd.f32 %v2261_v58, %v1682_v55  ;;  %v2235_v61 = vpop.f32.mrb[21].mxu0 }
 0x266   : > { %v2236_v62 = vadd.f32 %v2235_v61, %v2234_v59  ;;  %v2237_v63 = vpop.f32.mrb[22].mxu0 }
 0x267   : > { %v2262_v0 = vpop.f32.mrb[16].mxu1  ;;  %v2238_v1 = vpop.f32.mrb[23].mxu0 }
 0x268   : > { %v1687_v2 = vadd.f32 %v2236_v62, %v2049_v32  ;;  %v2263_v3 = vpop.f32.mrb[17].mxu1 }
 0x269   : > { %v2264_v4 = vadd.f32 %v2263_v3, %v2262_v0  ;;  %v2265_v5 = vpop.f32.mrb[18].mxu1 }
 0x26a   : > { %v2266_v6 = vpop.f32.mrb[19].mxu1 }
 0x26b   : > { %v1735_v7 = vadd.f32 %v2264_v4, %v1687_v2 }
 0x27c   : > { %v2284_v8 = vpop.f32.mrb[24].mxu0 }
 0x27d   : > { %v2285_v9 = vpop.f32.mrb[25].mxu0 }
 0x27e   : > { %v2286_v10 = vadd.f32 %v2285_v9, %v2284_v8  ;;  %v2287_v11 = vpop.f32.mrb[26].mxu0 }
 0x27f   : > { %v2344_v12 = vpop.f32.mrb[20].mxu1  ;;  %v2288_v13 = vpop.f32.mrb[27].mxu0 }
 0x280   : > { %v2289_v14 = vadd.f32 %v2288_v13, %v2287_v11  ;;  %v1775_v15 = vadd.f32 %v2286_v10, %v1727_v57  ;;  %v1822_v16 = vpop.f32.mrb[21].mxu1 }
 0x281   : > { %v2345_v17 = vpop.f32.mrb[22].mxu1 }
 0x282   : > { %v1823_v18 = vadd.f32 %v1822_v16, %v1775_v15  ;;  %v1778_v19 = vadd.f32 %v2289_v14, %v1730_v60  ;;  %v1825_v20 = vpop.f32.mrb[23].mxu1 }
 0x284   : > { %v1836_v21 = vmax.f32 %v1823_v18, 0.0  ;;  %v1826_v22 = vadd.f32 %v1825_v20, %v1778_v19  ;;  %v2290_v26 = vpop.f32.mrb[28].mxu0 }
 0x285   : > { %v2291_v23 = vpop.f32.mrb[29].mxu0 }
 0x286   : > { %1839 = vst [vmem:[%s271_s27] sm:$0xff] %v1836_v21  ;;  %v1837_v24 = vmax.f32 %v1826_v22, 0.0  ;;  %v2292_v25 = vadd.f32 %v2291_v23, %v2290_v26  ;;  %v2293_v27 = vpop.f32.mrb[30].mxu0 }
 0x287   : > { %v2294_v28 = vpop.f32.mrb[31].mxu0 }
 0x288   : > { %1840 = vst [vmem:[%s271_s27 + $0x8] sm:$0xff] %v1837_v24  ;;  %v1783_v29 = vadd.f32 %v2292_v25, %v1735_v7 }
 0x28a   : > { %v1831_v30 = vadd.f32 %v2344_v12, %v1783_v29 }
 0x28c   : > { %v1838_v31 = vmax.f32 %v1831_v30, 0.0 }
 0x28e   : > { %1841 = vst [vmem:[%s271_s27 + $0x10] sm:$0xff] %v1838_v31 }
 0x28f   : > { %2626 = shalt.err (!%p2623_p6)
}
 0x290   : > { %s2627_s12 = scalar_lea.hbm %s2988_s7, 384  ;;  %s2631_s17 = scalar_lea.hbm %s3043_s5, 768 }
 0x291   : > { %p2628_p7 = scmp.ne.s32.totalorder %s2988_s7, %s2627_s12  ;;  %p2632_p0 = scmp.lt.u32.totalorder %s2988_s7, %s3043_s5 }
 0x292   : > { %p2633_p4 = scmp.lt.u32.totalorder %s2631_s17, %s2627_s12  ;;  %p2635_p1 = scmp.lt.u32.totalorder %s2627_s12, %s2988_s7 }
 0x293   : > { %p2629_p9 = pnand %p2628_p7, %p3057_p8 }
 0x294   : > { %p2634_p13 = por %p2633_p4, %p2632_p0 }
 0x295   : > { %p2630_p12 = pneg %p2629_p9 }
 0x296   : > { %p2636_p10 = por %p2635_p1, %p2634_p13 }
 0x298   : > { %p2637_p11 = pnand %p2636_p10, %p2630_p12 }
 0x29a   : > { %2640 = shalt.err (!%p2637_p11)
}
 0x29b   : > { %s2706_s27 = smov 128   ;;  %s2707_s10 = smov 8  }
 0x29c   : > { %2357 = dma.vmem_to_hbm [thread:$0]  (%p3057_p8), %s2983_s29, 384, %s2988_s7, %s2992_s8, %s2706_s27, %s2706_s27, %s2707_s10  }
 0x29d PF: > { %p2374_p2 = scmp.ge.s32.totalorder %s2699_s23, 2  ;;  %s1873_s26 = sand.u32 1, %s2679_s18  }
 0x29e   : > { %p3058_p3 = scmp.ne.s32.totalorder %s3051_s30, 0  ;;  %s1874_s14 = scalar_lea.sflag [#allocation5], %s1873_s26 }
 0x2a0   : > { %p2367_p5 = pnand %p2374_p2, %p3058_p3 }
 0x2a2   : > { %2674 = dma.done.wait (!%p2367_p5), %s1874_s14, 384  }
 0x2a3   : > { %2676 = vsyncadd (!%p2367_p5), %s1874_s14, 4294966912  ;;  %s20_s23 = sadd.s32 1, %s2699_s23   ;;  %s3059_s28 = sld [smem:[#allocation12_spill]] }
 0x2a4   : > { %p17_p6 = scmp.ge.s32.totalorder %s20_s23, 4   ;;  %s3060_s18 = smov %s2683_s19 }
 0x2a5   : > { %s3061_s19 = smov %s2687_s20  ;;  %s3062_s20 = smov %s2791_s6 }
 0x2a6   : > { %s3063_s21 = smov %s2695_s22  ;;  %19 = sbr.rel (!%p17_p6) target bundleno = 6 (0x6), region = 84 }
 0x2a9   : > { %s3064_s22 = smov %s3059_s28 }
 0x2ad   :  { %1879 = vsyncpa [#allocation4], 1 }
 0x2ae   :  { %1881 = vsyncpa [#allocation4 + $0x1], 1 }
 0x2af   :  { %1882 = vsyncpa [#allocation7], 1 }
 0x2b0   :  { %1883 = vsyncpa [#allocation5], 1 }
 0x2b1   :  { %1885 = vsyncpa [#allocation5 + $0x1], 1 }

</bundles_post_ra>
